<compile_context>
chip_gen: v7x
topology: tpu7x:2x2x1
jax: 0.10.0
libtpu: 0.0.40
codegen_flags: <defaults>
</compile_context>

<pallas_src>
import math

import jax
import jax.numpy as jnp
from jax.experimental import pallas as pl
from jax.experimental.pallas import tpu as pltpu

_LANE = 128


def _round_up(n, m):
    return ((n + m - 1) // m) * m


def actor_kernel(x_ref, w1_ref, b1_ref, w2_ref, b2_ref, w3_ref, b3_ref, o_ref):
    # Cast activations to the weight storage dtype so bf16 weights take the
    # native MXU input path; accumulation stays f32 via preferred_element_type.
    x = x_ref[...].astype(w1_ref.dtype)
    h1 = jnp.dot(x, w1_ref[...], preferred_element_type=jnp.float32)
    h1 = jnp.maximum(h1 + b1_ref[...], 0.0)
    h2 = jnp.dot(h1.astype(w2_ref.dtype), w2_ref[...],
                 preferred_element_type=jnp.float32)
    h2 = jnp.maximum(h2 + b2_ref[...], 0.0)
    h3 = jnp.dot(h2.astype(w3_ref.dtype), w3_ref[...],
                 preferred_element_type=jnp.float32)
    o_ref[...] = jnp.tanh(h3 + b3_ref[...]).astype(o_ref.dtype)


def actor_forward(x, params, *, block_b=256):
    """x: [B, state_dim]. params from init_actor_params (W stored [in, out],
    hidden / output columns lane-padded with zeros, biases [1, out] in f32)."""
    w1, b1 = params["linear1"]
    w2, b2 = params["linear2"]
    w3, b3 = params["linear3"]
    action_dim = params["action_dim"]

    B, S = x.shape
    H_pad = w1.shape[1]
    A_pad = w3.shape[1]

    # Batch tiling: one full block if B is small, otherwise fixed tiles so the
    # batch axis is software-pipelined (and megacore-sharded on v7x).
    if B <= block_b:
        tb = B
        B_pad = B
    else:
        tb = block_b
        B_pad = _round_up(B, tb)
    if B_pad != B:
        x = jnp.pad(x, ((0, B_pad - B), (0, 0)))

    grid = (B_pad // tb,)

    # Weights/biases: same block index every grid step => stay resident in VMEM.
    resident = lambda shape: pl.BlockSpec(shape, lambda i: (0, 0))

    nbytes = lambda a: a.size * a.dtype.itemsize
    weight_bytes = sum(nbytes(a) for a in (w1, b1, w2, b2, w3, b3))
    stream_bytes = 2 * (tb * S * x.dtype.itemsize + tb * A_pad * 4)  # dbl-buffered
    vmem_limit = int(min(2 * weight_bytes + stream_bytes + (8 << 20), 48 << 20))

    cost = pl.CostEstimate(
        flops=2 * B_pad * (S * H_pad + H_pad * H_pad + H_pad * A_pad),
        transcendentals=B_pad * A_pad,
        bytes_accessed=weight_bytes
        + B_pad * S * x.dtype.itemsize
        + B_pad * A_pad * 4,
    )

    out = pl.pallas_call(
        actor_kernel,
        out_shape=jax.ShapeDtypeStruct((B_pad, A_pad), jnp.float32),
        grid=grid,
        in_specs=[
            pl.BlockSpec((tb, S), lambda i: (i, 0)),
            resident(w1.shape), resident(b1.shape),
            resident(w2.shape), resident(b2.shape),
            resident(w3.shape), resident(b3.shape),
        ],
        out_specs=pl.BlockSpec((tb, A_pad), lambda i: (i, 0)),
        compiler_params=pltpu.CompilerParams(
            dimension_semantics=("parallel",),
            vmem_limit_bytes=vmem_limit,
        ),
        cost_estimate=cost,
    )(x, w1, b1, w2, b2, w3, b3)

    return out[:B, :action_dim]


def init_actor_params(key, state_dim, action_dim, hidden_dim, init_w=0.003,
                      weight_dtype=jnp.float32):
    """Mirrors the PyTorch module's init: linear1/linear2 use nn.Linear's
    default uniform(-1/sqrt(fan_in), +), linear3 uses uniform(-init_w, init_w).
    Weights stored [in, out]; hidden and output feature dims are zero-padded to
    multiples of 128 lanes (inert padding: relu(0)=0, tanh(0)=0)."""
    keys = jax.random.split(key, 6)

    def uniform(k, shape, bound):
        return jax.random.uniform(
            k, shape, dtype=jnp.float32, minval=-bound, maxval=bound)

    b1_bound = 1.0 / math.sqrt(state_dim)
    b2_bound = 1.0 / math.sqrt(hidden_dim)

    w1 = uniform(keys[0], (state_dim, hidden_dim), b1_bound)
    b1 = uniform(keys[1], (1, hidden_dim), b1_bound)
    w2 = uniform(keys[2], (hidden_dim, hidden_dim), b2_bound)
    b2 = uniform(keys[3], (1, hidden_dim), b2_bound)
    w3 = uniform(keys[4], (hidden_dim, action_dim), init_w)
    b3 = uniform(keys[5], (1, action_dim), init_w)

    # Lane-pad hidden + action dims so every matmul operand / store inside the
    # kernel is lane-dense (unmasked).  Zero padding keeps the math identical:
    # padded hidden units compute relu(0 + 0) = 0 and their zero weight rows
    # contribute nothing downstream; padded output lanes are tanh(0) = 0 and
    # are sliced off by the wrapper.
    h_pad = _round_up(hidden_dim, _LANE)
    a_pad = _round_up(action_dim, _LANE)

    w1p = jnp.zeros((state_dim, h_pad), jnp.float32).at[:, :hidden_dim].set(w1)
    b1p = jnp.zeros((1, h_pad), jnp.float32).at[:, :hidden_dim].set(b1)
    w2p = jnp.zeros((h_pad, h_pad), jnp.float32).at[:hidden_dim, :hidden_dim].set(w2)
    b2p = jnp.zeros((1, h_pad), jnp.float32).at[:, :hidden_dim].set(b2)
    w3p = jnp.zeros((h_pad, a_pad), jnp.float32).at[:hidden_dim, :action_dim].set(w3)
    b3p = jnp.zeros((1, a_pad), jnp.float32).at[:, :action_dim].set(b3)

    wd = weight_dtype
    return {
        "linear1": (w1p.astype(wd), b1p),   # biases stay f32 (accumulation dtype)
        "linear2": (w2p.astype(wd), b2p),
        "linear3": (w3p.astype(wd), b3p),
        "action_dim": action_dim,
    }


def actor_reference(x, params):
    """Plain-JAX reference (same math, f32; padding is inert)."""
    w1, b1 = params["linear1"]
    w2, b2 = params["linear2"]
    w3, b3 = params["linear3"]
    a = params["action_dim"]
    f32 = lambda t: t.astype(jnp.float32)
    h = jnp.maximum(x @ f32(w1) + f32(b1), 0.0)
    h = jnp.maximum(h @ f32(w2) + f32(b2), 0.0)
    return jnp.tanh(h @ f32(w3) + f32(b3))[:, :a]


if __name__ == "__main__":
    key = jax.random.PRNGKey(0)
    k_params, k_x, k_x2 = jax.random.split(key, 3)

    batch, state_dim, action_dim, hidden_dim = 2, 16, 4, 32

    # f32 weights: same math as the PyTorch reference module.
    params = init_actor_params(k_params, state_dim, action_dim, hidden_dim)
    x = jax.random.normal(k_x, (batch, state_dim), dtype=jnp.float32)
    out = jax.block_until_ready(actor_forward(x, params))
    ref = actor_reference(x, params)
    assert out.shape == (batch, action_dim)
    assert jnp.allclose(out, ref, atol=1e-5, rtol=1e-5), "f32 small-batch mismatch"

    # Larger, non-multiple batch exercises the tiled grid + batch-padding path.
    xb = jax.random.normal(k_x2, (300, state_dim), dtype=jnp.float32)
    outb = jax.block_until_ready(actor_forward(xb, params, block_b=256))
    refb = actor_reference(xb, params)
    assert outb.shape == (300, action_dim)
    assert jnp.allclose(outb, refb, atol=1e-5, rtol=1e-5), "f32 tiled-batch mismatch"

    # bf16 weight storage (halves dominant HBM weight traffic); f32 accumulation.
    params_bf16 = init_actor_params(
        k_params, state_dim, action_dim, hidden_dim, weight_dtype=jnp.bfloat16)
    out16 = jax.block_until_ready(actor_forward(xb, params_bf16, block_b=256))
    ref16 = actor_reference(xb, params_bf16)
    assert out16.shape == (300, action_dim)
    assert jnp.allclose(out16, ref16, atol=5e-2, rtol=5e-2), "bf16 mismatch"

    print("KERNEL_OK")
</pallas_src>

<mosaic_0001>
module attributes {stable_mosaic.version = 11 : i64} {
  func.func @actor_kernel(%arg0: i32, %arg1: memref<2x16xf32, #tpu.memory_space<vmem>>, %arg2: memref<16x128xf32, #tpu.memory_space<vmem>>, %arg3: memref<1x128xf32, #tpu.memory_space<vmem>>, %arg4: memref<128x128xf32, #tpu.memory_space<vmem>>, %arg5: memref<1x128xf32, #tpu.memory_space<vmem>>, %arg6: memref<128x128xf32, #tpu.memory_space<vmem>>, %arg7: memref<1x128xf32, #tpu.memory_space<vmem>>, %arg8: memref<2x128xf32, #tpu.memory_space<vmem>>) attributes {dimension_semantics = [#tpu.dimension_semantics<parallel>], iteration_bounds = array<i64: 1>, scalar_prefetch = 0 : i64, scratch_operands = 0 : i64, tpu.core_type = #tpu.core_type<tc>, window_params = [{transform_indices = @transform_0, window_bounds = array<i64: 2, 16>}, {pipeline_mode = #tpu.pipeline_mode<synchronous>, transform_indices = @transform_1, window_bounds = array<i64: 16, 128>}, {pipeline_mode = #tpu.pipeline_mode<synchronous>, transform_indices = @transform_2, window_bounds = array<i64: 1, 128>}, {pipeline_mode = #tpu.pipeline_mode<synchronous>, transform_indices = @transform_3, window_bounds = array<i64: 128, 128>}, {pipeline_mode = #tpu.pipeline_mode<synchronous>, transform_indices = @transform_4, window_bounds = array<i64: 1, 128>}, {pipeline_mode = #tpu.pipeline_mode<synchronous>, transform_indices = @transform_5, window_bounds = array<i64: 128, 128>}, {pipeline_mode = #tpu.pipeline_mode<synchronous>, transform_indices = @transform_6, window_bounds = array<i64: 1, 128>}, {transform_indices = @transform_7, window_bounds = array<i64: 2, 128>}]} {
    %c0 = arith.constant 0 : index
    %c0_0 = arith.constant 0 : index
    %0 = vector.load %arg1[%c0, %c0_0] : memref<2x16xf32, #tpu.memory_space<vmem>>, vector<2x16xf32>
    %c0_1 = arith.constant 0 : index
    %c0_2 = arith.constant 0 : index
    %1 = vector.load %arg2[%c0_1, %c0_2] : memref<16x128xf32, #tpu.memory_space<vmem>>, vector<16x128xf32>
    %cst = arith.constant dense<0.000000e+00> : vector<2x128xf32>
    %2 = tpu.matmul %0, %1, %cst {dimension_numbers = #tpu.dot_dimension_numbers<[1], [0], [0], [1], [0, 0, 1, 1], [], []>} : vector<2x16xf32>, vector<16x128xf32>, vector<2x128xf32> -> vector<2x128xf32>
    %c0_3 = arith.constant 0 : index
    %c0_4 = arith.constant 0 : index
    %3 = vector.load %arg3[%c0_3, %c0_4] : memref<1x128xf32, #tpu.memory_space<vmem>>, vector<1x128xf32>
    %4 = vector.broadcast %3 : vector<1x128xf32> to vector<2x128xf32>
    %5 = arith.addf %2, %4 : vector<2x128xf32>
    %cst_5 = arith.constant 0.000000e+00 : f32
    %6 = vector.broadcast %cst_5 : f32 to vector<2x128xf32>
    %7 = arith.maximumf %5, %6 : vector<2x128xf32>
    %c0_6 = arith.constant 0 : index
    %c0_7 = arith.constant 0 : index
    %8 = vector.load %arg4[%c0_6, %c0_7] : memref<128x128xf32, #tpu.memory_space<vmem>>, vector<128x128xf32>
    %cst_8 = arith.constant dense<0.000000e+00> : vector<2x128xf32>
    %9 = tpu.matmul %7, %8, %cst_8 {dimension_numbers = #tpu.dot_dimension_numbers<[1], [0], [0], [1], [0, 0, 1, 1], [], []>} : vector<2x128xf32>, vector<128x128xf32>, vector<2x128xf32> -> vector<2x128xf32>
    %c0_9 = arith.constant 0 : index
    %c0_10 = arith.constant 0 : index
    %10 = vector.load %arg5[%c0_9, %c0_10] : memref<1x128xf32, #tpu.memory_space<vmem>>, vector<1x128xf32>
    %11 = vector.broadcast %10 : vector<1x128xf32> to vector<2x128xf32>
    %12 = arith.addf %9, %11 : vector<2x128xf32>
    %cst_11 = arith.constant 0.000000e+00 : f32
    %13 = vector.broadcast %cst_11 : f32 to vector<2x128xf32>
    %14 = arith.maximumf %12, %13 : vector<2x128xf32>
    %c0_12 = arith.constant 0 : index
    %c0_13 = arith.constant 0 : index
    %15 = vector.load %arg6[%c0_12, %c0_13] : memref<128x128xf32, #tpu.memory_space<vmem>>, vector<128x128xf32>
    %cst_14 = arith.constant dense<0.000000e+00> : vector<2x128xf32>
    %16 = tpu.matmul %14, %15, %cst_14 {dimension_numbers = #tpu.dot_dimension_numbers<[1], [0], [0], [1], [0, 0, 1, 1], [], []>} : vector<2x128xf32>, vector<128x128xf32>, vector<2x128xf32> -> vector<2x128xf32>
    %c0_15 = arith.constant 0 : index
    %c0_16 = arith.constant 0 : index
    %17 = vector.load %arg7[%c0_15, %c0_16] : memref<1x128xf32, #tpu.memory_space<vmem>>, vector<1x128xf32>
    %18 = vector.broadcast %17 : vector<1x128xf32> to vector<2x128xf32>
    %19 = arith.addf %16, %18 : vector<2x128xf32>
    %20 = math.tanh %19 : vector<2x128xf32>
    %c0_17 = arith.constant 0 : index
    %c0_18 = arith.constant 0 : index
    %21 = vector.load %arg8[%c0_17, %c0_18] : memref<2x128xf32, #tpu.memory_space<vmem>>, vector<2x128xf32>
    tpu.vector_store %arg8[%c0_17, %c0_18], %20 {strides = array<i32>} : memref<2x128xf32, #tpu.memory_space<vmem>>, vector<2x128xf32>,
    return
  }
  func.func @transform_0(%arg0: i32) -> (i32, i32) {
    %c0_i32 = arith.constant 0 : i32
    %c0_i32_0 = arith.constant 0 : i32
    return %arg0, %c0_i32 : i32, i32
  }
  func.func @transform_1(%arg0: i32) -> (i32, i32) {
    %c0_i32 = arith.constant 0 : i32
    %c0_i32_0 = arith.constant 0 : i32
    %c0_i32_1 = arith.constant 0 : i32
    return %c0_i32, %c0_i32_0 : i32, i32
  }
  func.func @transform_2(%arg0: i32) -> (i32, i32) {
    %c0_i32 = arith.constant 0 : i32
    %c0_i32_0 = arith.constant 0 : i32
    %c0_i32_1 = arith.constant 0 : i32
    return %c0_i32, %c0_i32_0 : i32, i32
  }
  func.func @transform_3(%arg0: i32) -> (i32, i32) {
    %c0_i32 = arith.constant 0 : i32
    %c0_i32_0 = arith.constant 0 : i32
    %c0_i32_1 = arith.constant 0 : i32
    return %c0_i32, %c0_i32_0 : i32, i32
  }
  func.func @transform_4(%arg0: i32) -> (i32, i32) {
    %c0_i32 = arith.constant 0 : i32
    %c0_i32_0 = arith.constant 0 : i32
    %c0_i32_1 = arith.constant 0 : i32
    return %c0_i32, %c0_i32_0 : i32, i32
  }
  func.func @transform_5(%arg0: i32) -> (i32, i32) {
    %c0_i32 = arith.constant 0 : i32
    %c0_i32_0 = arith.constant 0 : i32
    %c0_i32_1 = arith.constant 0 : i32
    return %c0_i32, %c0_i32_0 : i32, i32
  }
  func.func @transform_6(%arg0: i32) -> (i32, i32) {
    %c0_i32 = arith.constant 0 : i32
    %c0_i32_0 = arith.constant 0 : i32
    %c0_i32_1 = arith.constant 0 : i32
    return %c0_i32, %c0_i32_0 : i32, i32
  }
  func.func @transform_7(%arg0: i32) -> (i32, i32) {
    %c0_i32 = arith.constant 0 : i32
    %c0_i32_0 = arith.constant 0 : i32
    return %arg0, %c0_i32 : i32, i32
  }
}

</mosaic_0001>

<bundles_post_ra>
// kernel: tpu_custom_call.1
= control target key start
LH: loop header
LB: loop body
LE: loop exit
PB: predicated region body
PF: predicated region fallthrough
CT: control target
= control target key end

     0   :  { %12 = vsyncpa [#allocation3], 0  ;;  %s818_s0 = inlined_call_operand.hbm [shape: f32[2,16], index: 0, kind: input, shape index: {}]   ;;  %s819_s1 = inlined_call_operand.hbm [shape: f32[16,128], index: 1, kind: input, shape index: {}]   ;;  %s820_s2 = inlined_call_operand.vmem [shape: f32[1,128], index: 2, kind: input, shape index: {}]   ;;  %s821_s3 = inlined_call_operand.hbm [shape: f32[128,128], index: 3, kind: input, shape index: {}]   ;;  %s822_s4 = inlined_call_operand.vmem [shape: f32[1,128], index: 4, kind: input, shape index: {}]   ;;  %s823_s5 = inlined_call_operand.hbm [shape: f32[128,128], index: 5, kind: input, shape index: {}]   ;;  %s824_s6 = inlined_call_operand.vmem [shape: f32[1,128], index: 6, kind: input, shape index: {}]   ;;  %s825_s7 = inlined_call_operand.hbm [shape: f32[2,128], index: 7, kind: output, shape index: {}]  }
   0x1   :  { %13 = vsyncpa [#allocation6], 0 }
   0x2   :  { %14 = vsyncpa [#allocation9], 0 }
   0x3   :  { %15 = vsyncpa [#allocation4], 0  ;;  %s670_s24 = smov [#allocation5]   ;;  %s552_s28 = scalar_lea.hbm %s819_s1, 256 }
   0x4   :  { %s31_s25 = sshll.u32 %s670_s24, 4  ;;  %p553_p0 = scmp.ne.s32.totalorder %s819_s1, %s552_s28  ;;  %s32_s25 = int_to_ptr.vmem [resolvable:$true] %s31_s25 }
   0x5   :  { %p556_p1 = scmp.lt.u32.totalorder %s552_s28, %s819_s1 }
   0x7   :  { %p558_p2 = pnand %p556_p1, %p553_p0 }
   0x9   :  { %561 = shalt.err (!%p558_p2)
}
   0xa   :  { %s562_s10 = scalar_lea.vmem %s32_s25, 256  ;;  %p567_p4 = scmp.lt.s32.totalorder %s32_s25, %s32_s25 }
   0xb   :  { %p563_p3 = scmp.ne.s32.totalorder %s32_s25, %s562_s10  ;;  %p568_p5 = scmp.lt.s32.totalorder %s562_s10, %s562_s10 }
   0xd   :  { %p569_p6 = por %p568_p5, %p567_p4 }
   0xf   :  { %p570_p7 = pnand %p569_p6, %p563_p3 }
  0x11   :  { %573 = shalt.err (!%p570_p7)
}
  0x12   :  { %s671_s11 = smov 128   ;;  %s672_s12 = smov 8  }
  0x13   :  { %37 = dma.hbm_to_vmem [thread:$0]  %s819_s1, 256, %s32_s25, [#allocation6], %s671_s11, %s671_s11, %s672_s12  }
  0x14   :  { %s673_s15 = smov [#allocation2]   ;;  %s674_s17 = smov [#allocation7]  }
  0x15   :  { %s22_s16 = sshll.u32 %s673_s15, 4  ;;  %s45_s18 = sshll.u32 %s674_s17, 4  ;;  %s23_s16 = int_to_ptr.vmem [resolvable:$true] %s22_s16  ;;  %s46_s18 = int_to_ptr.vmem [resolvable:$true] %s45_s18 }
  0x16   :  { %s574_s21 = scalar_lea.hbm %s818_s0, 32 }
  0x17   :  { %p575_p8 = scmp.ne.s32.totalorder %s818_s0, %s574_s21  ;;  %p578_p9 = scmp.lt.u32.totalorder %s574_s21, %s818_s0 }
  0x19   :  { %p580_p10 = pnand %p578_p9, %p575_p8 }
  0x1b   :  { %583 = shalt.err (!%p580_p10)
}
  0x1c   :  { %s584_s1 = scalar_lea.vmem %s23_s16, 32  ;;  %p589_p12 = scmp.lt.s32.totalorder %s23_s16, %s23_s16 }
  0x1d   :  { %p585_p11 = scmp.ne.s32.totalorder %s23_s16, %s584_s1  ;;  %p590_p13 = scmp.lt.s32.totalorder %s584_s1, %s584_s1 }
  0x1f   :  { %p591_p0 = por %p590_p13, %p589_p12 }
  0x21   :  { %p592_p1 = pnand %p591_p0, %p585_p11 }
  0x23   :  { %595 = shalt.err (!%p592_p1)
}
  0x24   :  { %25 = dma.hbm_to_vmem [thread:$0]  %s818_s0, 32, %s23_s16, [#allocation3]  }
  0x25   :  { %s596_s30 = scalar_lea.hbm %s821_s3, 2048 }
  0x26   :  { %p597_p2 = scmp.ne.s32.totalorder %s821_s3, %s596_s30  ;;  %p600_p3 = scmp.lt.u32.totalorder %s596_s30, %s821_s3 }
  0x28   :  { %p602_p4 = pnand %p600_p3, %p597_p2 }
  0x2a   :  { %605 = shalt.err (!%p602_p4)
}
  0x2b   :  { %s606_s14 = scalar_lea.vmem %s46_s18, 2048  ;;  %p611_p6 = scmp.lt.s32.totalorder %s46_s18, %s46_s18 }
  0x2c   :  { %p607_p5 = scmp.ne.s32.totalorder %s46_s18, %s606_s14  ;;  %p612_p7 = scmp.lt.s32.totalorder %s606_s14, %s606_s14 }
  0x2e   :  { %p613_p8 = por %p612_p7, %p611_p6 }
  0x30   :  { %p614_p9 = pnand %p613_p8, %p607_p5 }
  0x32   :  { %617 = shalt.err (!%p614_p9)
}
  0x33   :  { %51 = dma.hbm_to_vmem [thread:$0]  %s821_s3, 2048, %s46_s18, [#allocation6], %s671_s11, %s671_s11, %s672_s12  }
  0x34   :  { %s675_s16 = smov [#allocation8]   ;;  %s618_s21 = scalar_lea.hbm %s823_s5, 2048 }
  0x35   :  { %s59_s17 = sshll.u32 %s675_s16, 4  ;;  %p619_p10 = scmp.ne.s32.totalorder %s823_s5, %s618_s21  ;;  %s60_s17 = int_to_ptr.vmem [resolvable:$true] %s59_s17 }
  0x36   :  { %p622_p11 = scmp.lt.u32.totalorder %s618_s21, %s823_s5 }
  0x38   :  { %p624_p12 = pnand %p622_p11, %p619_p10 }
  0x3a   :  { %627 = shalt.err (!%p624_p12)
}
  0x3b   :  { %s628_s1 = scalar_lea.vmem %s60_s17, 2048  ;;  %p633_p0 = scmp.lt.s32.totalorder %s60_s17, %s60_s17 }
  0x3c   :  { %p629_p13 = scmp.ne.s32.totalorder %s60_s17, %s628_s1  ;;  %p634_p1 = scmp.lt.s32.totalorder %s628_s1, %s628_s1 }
  0x3e   :  { %p635_p2 = por %p634_p1, %p633_p0 }
  0x40   :  { %p636_p3 = pnand %p635_p2, %p629_p13 }
  0x42   :  { %639 = shalt.err (!%p636_p3)
}
  0x43   :  { %65 = dma.hbm_to_vmem [thread:$0]  %s823_s5, 2048, %s60_s17, [#allocation9], %s671_s11, %s671_s11, %s672_s12  }
  0x44   :  { %662 = dma.done.wait [#allocation3], 32  }
  0x45   :  { %663 = vsyncadd [#allocation3], 4294967264 }
  0x46   :  { %664 = dma.done.wait [#allocation6], 2304  }
  0x47   :  { %665 = vsyncadd [#allocation6], 4294964992 }
  0x48   :  { %666 = dma.done.wait [#allocation9], 2048  }
  0x49   :  { %667 = vsyncadd [#allocation9], 4294965248  ;;  %v676_v0 = vmov 0.0|0.0   ;;  %vm677_vm0 = vmmov 0   ;;  %v678_v1 = vmov 0.0   ;;  %v81_v2 = vld [vmem:[#allocation5] sm:$0xff] }
  0x4a   :  { %489 = vmatprep.subr.bf16.mxu0 %v676_v0  ;;  %416 = vmatprep.mubr.msk.f32.mxu0 %vm677_vm0, %v678_v1  ;;  %v82_v3 = vld [vmem:[#allocation5 + $0x8] sm:$0xff]  ;;  %v165_v5 = vld [vmem:[#allocation7] sm:$0xff]  ;;  %v166_v6 = vld [vmem:[#allocation7 + $0x8] sm:$0xff]  ;;  %vm90_vm1 = vcmask 130048   ;;  %s679_s28 = smov [#allocation10]  }
  0x4b   :  { %492 = vmatprep.subr.bf16.mxu1 %v676_v0  ;;  %451 = vmatprep.mubr.msk.f32.mxu1 %vm677_vm0, %v678_v1  ;;  %v490_v4 = vpack.c.bf16 %v82_v3, %v81_v2  ;;  %v167_v7 = vld [vmem:[#allocation7 + $0x10] sm:$0xff]  ;;  %v493_v8 = vpack.c.bf16 %v166_v6, %v165_v5  ;;  %v168_v9 = vld [vmem:[#allocation7 + $0x18] sm:$0xff]  ;;  %v80_v10 = vld [vmem:[#allocation2] sm:$0x3]  ;;  %s360_s29 = sshll.u32 %s679_s28, 4  ;;  %s361_s29 = int_to_ptr.vmem [resolvable:$true] %s360_s29 }
  0x4c   :  { %v496_v11 = vpack.c.bf16 %v168_v9, %v167_v7  ;;  %v169_v12 = vld [vmem:[#allocation7 + $0x20] sm:$0xff]  ;;  %v170_v13 = vld [vmem:[#allocation7 + $0x28] sm:$0xff]  ;;  %v171_v15 = vld [vmem:[#allocation7 + $0x30] sm:$0xff]  ;;  %s640_s30 = scalar_lea.vmem %s361_s29, 32  ;;  %p645_p5 = scmp.lt.s32.totalorder %s361_s29, %s361_s29 }
  0x4d   :  { %491 = vmatpush3.bf16.msra.mxu0 %v490_v4  ;;  %494 = vmatpush3.bf16.msra.mxu1 %v493_v8  ;;  %v499_v14 = vpack.c.bf16 %v170_v13, %v169_v12  ;;  %v172_v16 = vld [vmem:[#allocation7 + $0x38] sm:$0xff]  ;;  %v173_v18 = vld [vmem:[#allocation7 + $0x40] sm:$0xff]  ;;  %v174_v19 = vld [vmem:[#allocation7 + $0x48] sm:$0xff]  ;;  %p641_p4 = scmp.ne.s32.totalorder %s361_s29, %s640_s30  ;;  %p646_p6 = scmp.lt.s32.totalorder %s640_s30, %s640_s30 }
  0x4e   :  { %516 = vmatprep.subr.bf16.mxu0 %v676_v0  ;;  %495 = vmatprep.subr.bf16.mxu1 %v676_v0  ;;  %v502_v17 = vpack.c.bf16 %v172_v16, %v171_v15  ;;  %v505_v20 = vpack.c.bf16 %v174_v19, %v173_v18  ;;  %v175_v21 = vld [vmem:[#allocation7 + $0x50] sm:$0xff]  ;;  %v176_v22 = vld [vmem:[#allocation7 + $0x58] sm:$0xff]  ;;  %v177_v24 = vld [vmem:[#allocation7 + $0x60] sm:$0xff] }
  0x4f   :  { %v508_v23 = vpack.c.bf16 %v176_v22, %v175_v21  ;;  %v178_v25 = vld [vmem:[#allocation7 + $0x68] sm:$0xff]  ;;  %v179_v27 = vld [vmem:[#allocation7 + $0x70] sm:$0xff]  ;;  %v180_v28 = vld [vmem:[#allocation7 + $0x78] sm:$0xff]  ;;  %p647_p7 = por %p646_p6, %p645_p5 }
  0x50   :  { %417 = vmatmul.mubr.msk.f32.vlgmr.msra.gmra.mrb[0].mxu0 %vm90_vm1, %v80_v10  ;;  %v511_v26 = vpack.c.bf16 %v178_v25, %v177_v24  ;;  %v514_v29 = vpack.c.bf16 %v180_v28, %v179_v27  ;;  %v259_v30 = vld [vmem:[#allocation8] sm:$0xff]  ;;  %v260_v31 = vld [vmem:[#allocation8 + $0x8] sm:$0xff]  ;;  %v261_v32 = vld [vmem:[#allocation8 + $0x10] sm:$0xff] }
  0x51   :  { %486 = vmatprep.mubr.msk.f32.mxu0 %vm677_vm0, %v678_v1  ;;  %497 = vmatpush3.bf16.msra.mxu1 %v496_v11  ;;  %v517_v33 = vpack.c.bf16 %v260_v31, %v259_v30  ;;  %v262_v34 = vld [vmem:[#allocation8 + $0x18] sm:$0xff]  ;;  %v263_v36 = vld [vmem:[#allocation8 + $0x20] sm:$0xff]  ;;  %v264_v37 = vld [vmem:[#allocation8 + $0x28] sm:$0xff]  ;;  %p648_p8 = pnand %p647_p7, %p641_p4 }
  0x52   :  { %498 = vmatprep.subr.bf16.mxu1 %v676_v0  ;;  %v520_v35 = vpack.c.bf16 %v262_v34, %v261_v32  ;;  %v523_v38 = vpack.c.bf16 %v264_v37, %v263_v36  ;;  %v265_v39 = vld [vmem:[#allocation8 + $0x30] sm:$0xff]  ;;  %v266_v40 = vld [vmem:[#allocation8 + $0x38] sm:$0xff]  ;;  %v267_v42 = vld [vmem:[#allocation8 + $0x40] sm:$0xff] }
  0x53   :  { %518 = vmatpush3.bf16.msra.mxu0 %v517_v33  ;;  %v526_v41 = vpack.c.bf16 %v266_v40, %v265_v39  ;;  %v268_v43 = vld [vmem:[#allocation8 + $0x48] sm:$0xff]  ;;  %v269_v45 = vld [vmem:[#allocation8 + $0x50] sm:$0xff]  ;;  %v270_v46 = vld [vmem:[#allocation8 + $0x58] sm:$0xff] }
  0x54   :  { %519 = vmatprep.subr.bf16.mxu0 %v676_v0  ;;  %v529_v44 = vpack.c.bf16 %v268_v43, %v267_v42  ;;  %v532_v47 = vpack.c.bf16 %v270_v46, %v269_v45  ;;  %v271_v48 = vld [vmem:[#allocation8 + $0x60] sm:$0xff]  ;;  %v272_v49 = vld [vmem:[#allocation8 + $0x68] sm:$0xff]  ;;  %v273_v56 = vld [vmem:[#allocation8 + $0x70] sm:$0xff] }
  0x55   :  { %500 = vmatpush3.bf16.msra.mxu1 %v499_v14  ;;  %v535_v50 = vpack.c.bf16 %v272_v49, %v271_v48  ;;  %v371_v51 = vld [vmem:[%s820_s2] ss:$0 sm:$0xff]  ;;  %v274_v57 = vld [vmem:[#allocation8 + $0x78] sm:$0xff] }
  0x56   :  { %501 = vmatprep.subr.bf16.mxu1 %v676_v0  ;;  %v538_v58 = vpack.c.bf16 %v274_v57, %v273_v56  ;;  %v373_v59 = vld [vmem:[%s822_s4] ss:$0 sm:$0xff] }
  0x57   :  { %521 = vmatpush3.bf16.msra.mxu0 %v520_v35 }
  0x58   :  { %522 = vmatprep.subr.bf16.mxu0 %v676_v0 }
  0x59   :  { %503 = vmatpush3.bf16.msra.mxu1 %v502_v17 }
  0x5a   :  { %504 = vmatprep.subr.bf16.mxu1 %v676_v0 }
  0x5b   :  { %524 = vmatpush3.bf16.msra.mxu0 %v523_v38 }
  0x5c   :  { %525 = vmatprep.subr.bf16.mxu0 %v676_v0 }
  0x5d   :  { %506 = vmatpush3.bf16.msra.mxu1 %v505_v20 }
  0x5e   :  { %507 = vmatprep.subr.bf16.mxu1 %v676_v0 }
  0x5f   :  { %527 = vmatpush3.bf16.msra.mxu0 %v526_v41 }
  0x60   :  { %528 = vmatprep.subr.bf16.mxu0 %v676_v0 }
  0x61   :  { %509 = vmatpush3.bf16.msra.mxu1 %v508_v23 }
  0x62   :  { %510 = vmatprep.subr.bf16.mxu1 %v676_v0 }
  0x63   :  { %530 = vmatpush3.bf16.msra.mxu0 %v529_v44 }
  0x64   :  { %531 = vmatprep.subr.bf16.mxu0 %v676_v0 }
  0x65   :  { %512 = vmatpush3.bf16.msra.mxu1 %v511_v26 }
  0x66   :  { %513 = vmatprep.subr.bf16.mxu1 %v676_v0 }
  0x67   :  { %533 = vmatpush3.bf16.msra.mxu0 %v532_v47 }
  0x68   :  { %534 = vmatprep.subr.bf16.mxu0 %v676_v0 }
  0x69   :  { %515 = vmatpush3.bf16.msra.mxu1 %v514_v29 }
  0x6b   :  { %536 = vmatpush3.bf16.msra.mxu0 %v535_v50 }
  0x6c   :  { %537 = vmatprep.subr.bf16.mxu0 %v676_v0  ;;  %v374_v0 = vld [vmem:[%s824_s6] ss:$0 sm:$0xff] }
  0x6f   :  { %539 = vmatpush3.bf16.msra.mxu0 %v538_v58 }
 0x123   :  { %v160_v52 = vpop.f32.mrb[0].mxu0 }
 0x124   :  { %v161_v53 = vadd.f32 %v371_v51, %v160_v52  ;;  %v418_v54 = vpop.f32.mrb[1].mxu0 }
 0x126   :  { %v164_v55 = vmax.f32 %v161_v53, 0.0 }
 0x128   :  { %452 = vmatmul.mubr.f32.vlgmr.msra.gmra.mrb[0].mxu1 %v164_v55 }
 0x1fb   :  { %v254_v60 = vpop.f32.mrb[0].mxu1 }
 0x1fc   :  { %v255_v61 = vadd.f32 %v373_v59, %v254_v60  ;;  %v453_v62 = vpop.f32.mrb[1].mxu1 }
 0x1fe   :  { %v258_v63 = vmax.f32 %v255_v61, 0.0 }
 0x200   :  { %487 = vmatmul.mubr.f32.vlgmr.msra.gmra.mrb[2].mxu0 %v258_v63 }
 0x2d3   :  { %v348_v1 = vpop.f32.mrb[2].mxu0 }
 0x2d4   :  { %v349_v2 = vadd.f32 %v374_v0, %v348_v1  ;;  %v488_v3 = vpop.f32.mrb[3].mxu0 }
 0x2d6   :  { %550 = vtanh.f32 %v349_v2 }
 0x2e0   :  { %v551_v4 = vpop.eup %550 }
 0x2e1   :  { %353 = vst [vmem:[#allocation10] sm:$0x3] %v551_v4 }
 0x2e2   :  { %651 = shalt.err (!%p648_p8)
}
 0x2e3   :  { %s652_s6 = scalar_lea.hbm %s825_s7, 32 }
 0x2e4   :  { %p653_p9 = scmp.ne.s32.totalorder %s825_s7, %s652_s6  ;;  %p656_p10 = scmp.lt.u32.totalorder %s652_s6, %s825_s7 }
 0x2e6   :  { %p658_p11 = pnand %p656_p10, %p653_p9 }
 0x2e8   :  { %661 = shalt.err (!%p658_p11)
}
 0x2e9   :  { %363 = dma.vmem_to_hbm [thread:$0]  %s361_s29, 32, %s825_s7, [#allocation4]  }
 0x2ea   :  { %668 = dma.done.wait [#allocation4], 32  }
 0x2eb   :  { %669 = vsyncadd [#allocation4], 4294967264 }
 0x2ec   :  { %367 = vsyncpa [#allocation3], 1 }
 0x2ed   :  { %368 = vsyncpa [#allocation6], 1 }
 0x2ee   :  { %369 = vsyncpa [#allocation9], 1 }
 0x2ef   :  { %370 = vsyncpa [#allocation4], 1 }

</bundles_post_ra>
